<compile_context>
chip_gen: v5e
topology: v5e:2x2
jax: 0.10.0
libtpu: 0.0.40
codegen_flags: <defaults>
</compile_context>

<pallas_src>
import functools

import jax
import jax.numpy as jnp
from jax import lax
from jax.experimental import pallas as pl
from jax.experimental.pallas import tpu as pltpu


_NUM_CLASSES = 10
_C_PAD = 128            # lane-dense width for the fc3 / log_softmax tail
_NEG_INF = -1e30        # finite "-inf" used to mask the padded logit columns


def _fc_output_kernel(seed_ref, x_ref, w2_ref, b2_ref, w3_ref, b3_ref, o_ref):
    tb = x_ref.shape[0]          # batch-tile rows (static)
    hidden = w2_ref.shape[1]     # 256

    # ---- fc2: x @ W2 + b2  (bf16 MXU operands, f32 accumulate) ----
    h = jnp.dot(x_ref[...], w2_ref[...], preferred_element_type=jnp.float32)
    h = h + b2_ref[...]                                   # (1, H) broadcasts

    # ---- fused ReLU + Dropout(p=0.5), inverted scaling ----
    # Counter-based hash RNG: murmur3 finalizer over the global element index
    # xor'd with the seed.  Different batch tiles see different global row
    # indices, so masks never repeat across tiles/cores.
    row0 = pl.program_id(0) * tb
    rows = lax.broadcasted_iota(jnp.int32, (tb, hidden), 0) + row0
    cols = lax.broadcasted_iota(jnp.int32, (tb, hidden), 1)
    ctr = (rows * hidden + cols).astype(jnp.uint32)
    ctr = ctr ^ seed_ref[0].astype(jnp.uint32)
    ctr = ctr ^ (ctr >> 16)
    ctr = ctr * jnp.uint32(0x85EBCA6B)
    ctr = ctr ^ (ctr >> 13)
    ctr = ctr * jnp.uint32(0xC2B2AE35)
    ctr = ctr ^ (ctr >> 16)
    keep = (ctr & jnp.uint32(1)) == jnp.uint32(0)          # keep prob = 0.5
    h = jnp.where(jnp.logical_and(keep, h > 0.0), h * 2.0, 0.0)

    # ---- fc3: h @ W3 + b3 ----
    # W3 is zero-padded to 128 columns; the padded bias columns are -1e30 so
    # they contribute nothing to the log_softmax normalizer below.
    logits = jnp.dot(h.astype(jnp.bfloat16), w3_ref[...],
                     preferred_element_type=jnp.float32)
    logits = logits + b3_ref[...]

    # ---- log_softmax over the class axis ----
    m = jnp.max(logits, axis=-1, keepdims=True)
    shifted = logits - m
    lse = jnp.log(jnp.sum(jnp.exp(shifted), axis=-1, keepdims=True))
    o_ref[...] = (shifted - lse).astype(o_ref.dtype)


@functools.partial(jax.jit, static_argnames=("tb",))
def fc_output_model(x, w2, b2, w3, b3, seed, *, tb=None):
    """x: [B, 256] f32; w2: [256, 256]; w3: [256, 10] (stored [in, out]).

    Returns log-probabilities [B, 10] f32.
    """
    B, f_in = x.shape
    H = w2.shape[1]              # 256
    C = w3.shape[1]              # 10

    if tb is None:
        # Full batch if small (block == full dim is always legal), else a
        # 512-row tile (multiple of 8) so the pipeline overlaps DMA + compute.
        tb = B if B <= 512 else 512
    grid = (pl.cdiv(B, tb),)

    # bf16 MXU operands; accumulation stays f32 inside the kernel.
    x_bf = x.astype(jnp.bfloat16)
    w2_bf = w2.astype(jnp.bfloat16)

    # Lane-pad fc3 to 128 output columns.  Padded weight columns are zero and
    # padded bias columns are -1e30 so they drop out of the softmax.
    w3_pad = jnp.zeros((H, _C_PAD), jnp.bfloat16).at[:, :C].set(
        w3.astype(jnp.bfloat16))
    b3_pad = jnp.full((1, _C_PAD), _NEG_INF, jnp.float32).at[0, :C].set(
        b3.astype(jnp.float32))
    b2_2d = b2.reshape(1, H).astype(jnp.float32)
    seed_arr = jnp.asarray([seed], dtype=jnp.int32)

    grid_spec = pltpu.PrefetchScalarGridSpec(
        num_scalar_prefetch=1,
        grid=grid,
        in_specs=[
            pl.BlockSpec((tb, f_in), lambda i, seed: (i, 0)),      # x (tiled)
            pl.BlockSpec((f_in, H), lambda i, seed: (0, 0)),       # W2 resident
            pl.BlockSpec((1, H), lambda i, seed: (0, 0)),          # b2 resident
            pl.BlockSpec((H, _C_PAD), lambda i, seed: (0, 0)),     # W3 resident
            pl.BlockSpec((1, _C_PAD), lambda i, seed: (0, 0)),     # b3 resident
        ],
        out_specs=pl.BlockSpec((tb, _C_PAD), lambda i, seed: (i, 0)),
    )

    out_pad = pl.pallas_call(
        _fc_output_kernel,
        out_shape=jax.ShapeDtypeStruct((B, _C_PAD), jnp.float32),
        grid_spec=grid_spec,
        compiler_params=pltpu.CompilerParams(
            dimension_semantics=("parallel",)),
    )(seed_arr, x_bf, w2_bf, b2_2d, w3_pad, b3_pad)

    return out_pad[:, :C]


def _init_linear(key, fan_in, fan_out):
    # PyTorch nn.Linear default: U(-1/sqrt(fan_in), 1/sqrt(fan_in)).
    kw, kb = jax.random.split(key)
    bound = 1.0 / jnp.sqrt(fan_in)
    # Weight stored transposed: [in, out] so the kernel computes x @ W.
    w = jax.random.uniform(kw, (fan_in, fan_out), jnp.float32, -bound, bound)
    b = jax.random.uniform(kb, (fan_out,), jnp.float32, -bound, bound)
    return w, b


if __name__ == "__main__":
    key = jax.random.PRNGKey(0)
    kx, k2, k3 = jax.random.split(key, 3)

    B = 24                                   # small batch, exercises 3 tiles
    x = jax.random.normal(kx, (B, 256), jnp.float32)

    w2, b2 = _init_linear(k2, 256, 256)      # fc2: Linear(256, 256)
    w3, b3 = _init_linear(k3, 256, 10)       # fc3: Linear(256, 10)

    out = fc_output_model(x, w2, b2, w3, b3, seed=0, tb=8)
    out = jax.block_until_ready(out)

    assert out.shape == (B, 10)
    assert bool(jnp.all(jnp.isfinite(out)))
    # log_softmax rows should sum to ~1 in probability space
    assert jnp.allclose(jnp.sum(jnp.exp(out), axis=1), 1.0, atol=1e-3)
    print("KERNEL_OK")
</pallas_src>

<mosaic_0001>
module attributes {stable_mosaic.version = 11 : i64} {
  func.func @_fc_output_kernel(%arg0: i32, %arg1: memref<1xi32, #tpu.memory_space<smem>>, %arg2: memref<8x256xbf16, #tpu.memory_space<vmem>>, %arg3: memref<256x256xbf16, #tpu.memory_space<vmem>>, %arg4: memref<1x256xf32, #tpu.memory_space<vmem>>, %arg5: memref<256x128xbf16, #tpu.memory_space<vmem>>, %arg6: memref<1x128xf32, #tpu.memory_space<vmem>>, %arg7: memref<8x128xf32, #tpu.memory_space<vmem>>) attributes {dimension_semantics = [#tpu.dimension_semantics<parallel>], iteration_bounds = array<i64: 3>, scalar_prefetch = 1 : i64, scratch_operands = 0 : i64, tpu.core_type = #tpu.core_type<tc>, window_params = [{transform_indices = @transform_0, window_bounds = array<i64: 8, 256>}, {pipeline_mode = #tpu.pipeline_mode<synchronous>, transform_indices = @transform_1, window_bounds = array<i64: 256, 256>}, {pipeline_mode = #tpu.pipeline_mode<synchronous>, transform_indices = @transform_2, window_bounds = array<i64: 1, 256>}, {pipeline_mode = #tpu.pipeline_mode<synchronous>, transform_indices = @transform_3, window_bounds = array<i64: 256, 128>}, {pipeline_mode = #tpu.pipeline_mode<synchronous>, transform_indices = @transform_4, window_bounds = array<i64: 1, 128>}, {transform_indices = @transform_5, window_bounds = array<i64: 8, 128>}]} {
    %c0 = arith.constant 0 : index
    %c0_0 = arith.constant 0 : index
    %0 = vector.load %arg2[%c0, %c0_0] : memref<8x256xbf16, #tpu.memory_space<vmem>>, vector<8x256xbf16>
    %c0_1 = arith.constant 0 : index
    %c0_2 = arith.constant 0 : index
    %1 = vector.load %arg3[%c0_1, %c0_2] : memref<256x256xbf16, #tpu.memory_space<vmem>>, vector<256x256xbf16>
    %cst = arith.constant dense<0.000000e+00> : vector<8x256xf32>
    %2 = tpu.matmul %0, %1, %cst {dimension_numbers = #tpu.dot_dimension_numbers<[1], [0], [0], [1], [0, 0, 1, 1], [], []>} : vector<8x256xbf16>, vector<256x256xbf16>, vector<8x256xf32> -> vector<8x256xf32>
    %c0_3 = arith.constant 0 : index
    %c0_4 = arith.constant 0 : index
    %3 = vector.load %arg4[%c0_3, %c0_4] : memref<1x256xf32, #tpu.memory_space<vmem>>, vector<1x256xf32>
    %4 = vector.broadcast %3 : vector<1x256xf32> to vector<8x256xf32>
    %5 = arith.addf %2, %4 : vector<8x256xf32>
    %c8_i32 = arith.constant 8 : i32
    %6 = arith.muli %arg0, %c8_i32 : i32
    %7 = tpu.iota {dimensions = array<i32: 0>} : vector<8x256xi32>
    %8 = vector.broadcast %6 : i32 to vector<8x256xi32>
    %9 = arith.addi %7, %8 : vector<8x256xi32>
    %10 = tpu.iota {dimensions = array<i32: 1>} : vector<8x256xi32>
    %c256_i32 = arith.constant 256 : i32
    %11 = vector.broadcast %c256_i32 : i32 to vector<8x256xi32>
    %12 = arith.muli %9, %11 : vector<8x256xi32>
    %13 = arith.addi %12, %10 : vector<8x256xi32>
    %c0_5 = arith.constant 0 : index
    %14 = memref.load %arg1[%c0_5] : memref<1xi32, #tpu.memory_space<smem>>
    %15 = vector.broadcast %14 : i32 to vector<8x256xi32>
    %16 = arith.xori %13, %15 : vector<8x256xi32>
    %c16_i32 = arith.constant 16 : i32
    %17 = vector.broadcast %c16_i32 : i32 to vector<8x256xi32>
    %18 = arith.shrui %16, %17 : vector<8x256xi32>
    %19 = arith.xori %16, %18 : vector<8x256xi32>
    %c-2048144789_i32 = arith.constant -2048144789 : i32
    %20 = vector.broadcast %c-2048144789_i32 : i32 to vector<8x256xi32>
    %21 = arith.muli %19, %20 : vector<8x256xi32>
    %c13_i32 = arith.constant 13 : i32
    %22 = vector.broadcast %c13_i32 : i32 to vector<8x256xi32>
    %23 = arith.shrui %21, %22 : vector<8x256xi32>
    %24 = arith.xori %21, %23 : vector<8x256xi32>
    %c-1028477387_i32 = arith.constant -1028477387 : i32
    %25 = vector.broadcast %c-1028477387_i32 : i32 to vector<8x256xi32>
    %26 = arith.muli %24, %25 : vector<8x256xi32>
    %c16_i32_6 = arith.constant 16 : i32
    %27 = vector.broadcast %c16_i32_6 : i32 to vector<8x256xi32>
    %28 = arith.shrui %26, %27 : vector<8x256xi32>
    %29 = arith.xori %26, %28 : vector<8x256xi32>
    %c1_i32 = arith.constant 1 : i32
    %30 = vector.broadcast %c1_i32 : i32 to vector<8x256xi32>
    %31 = arith.andi %29, %30 : vector<8x256xi32>
    %c0_i32 = arith.constant 0 : i32
    %32 = vector.broadcast %c0_i32 : i32 to vector<8x256xi32>
    %33 = arith.cmpi eq, %31, %32 : vector<8x256xi32>
    %cst_7 = arith.constant 0.000000e+00 : f32
    %34 = vector.broadcast %cst_7 : f32 to vector<8x256xf32>
    %35 = arith.cmpf ogt, %5, %34 : vector<8x256xf32>
    %36 = arith.andi %33, %35 : vector<8x256xi1>
    %cst_8 = arith.constant 2.000000e+00 : f32
    %37 = vector.broadcast %cst_8 : f32 to vector<8x256xf32>
    %38 = arith.mulf %5, %37 : vector<8x256xf32>
    %cst_9 = arith.constant 0.000000e+00 : f32
    %39 = vector.broadcast %cst_9 : f32 to vector<8x256xf32>
    %40 = arith.select %36, %38, %39 : vector<8x256xi1>, vector<8x256xf32>
    %41 = arith.truncf %40 : vector<8x256xf32> to vector<8x256xbf16>
    %c0_10 = arith.constant 0 : index
    %c0_11 = arith.constant 0 : index
    %42 = vector.load %arg5[%c0_10, %c0_11] : memref<256x128xbf16, #tpu.memory_space<vmem>>, vector<256x128xbf16>
    %cst_12 = arith.constant dense<0.000000e+00> : vector<8x128xf32>
    %43 = tpu.matmul %41, %42, %cst_12 {dimension_numbers = #tpu.dot_dimension_numbers<[1], [0], [0], [1], [0, 0, 1, 1], [], []>} : vector<8x256xbf16>, vector<256x128xbf16>, vector<8x128xf32> -> vector<8x128xf32>
    %c0_13 = arith.constant 0 : index
    %c0_14 = arith.constant 0 : index
    %44 = vector.load %arg6[%c0_13, %c0_14] : memref<1x128xf32, #tpu.memory_space<vmem>>, vector<1x128xf32>
    %45 = vector.broadcast %44 : vector<1x128xf32> to vector<8x128xf32>
    %46 = arith.addf %43, %45 : vector<8x128xf32>
    %cst_15 = arith.constant dense<0xFF800000> : vector<8xf32>
    %47 = vector.multi_reduction <maximumf>, %46, %cst_15 [1] : vector<8x128xf32> to vector<8xf32>
    %48 = vector.shape_cast %47 : vector<8xf32> to vector<8x1xf32>
    %49 = vector.broadcast %48 : vector<8x1xf32> to vector<8x128xf32>
    %50 = arith.subf %46, %49 : vector<8x128xf32>
    %51 = math.exp %50 : vector<8x128xf32>
    %cst_16 = arith.constant dense<0.000000e+00> : vector<8xf32>
    %52 = vector.multi_reduction <add>, %51, %cst_16 [1] : vector<8x128xf32> to vector<8xf32>
    %53 = vector.shape_cast %52 : vector<8xf32> to vector<8x1xf32>
    %54 = math.log %53 : vector<8x1xf32>
    %55 = vector.broadcast %54 : vector<8x1xf32> to vector<8x128xf32>
    %56 = arith.subf %50, %55 : vector<8x128xf32>
    %c0_17 = arith.constant 0 : index
    %c0_18 = arith.constant 0 : index
    %57 = vector.load %arg7[%c0_17, %c0_18] : memref<8x128xf32, #tpu.memory_space<vmem>>, vector<8x128xf32>
    tpu.vector_store %arg7[%c0_17, %c0_18], %56 {strides = array<i32>} : memref<8x128xf32, #tpu.memory_space<vmem>>, vector<8x128xf32>,
    return
  }
  func.func @transform_0(%arg0: i32, %arg1: memref<1xi32, #tpu.memory_space<smem>>) -> (i32, i32) {
    %c0_i32 = arith.constant 0 : i32
    %c0_i32_0 = arith.constant 0 : i32
    return %arg0, %c0_i32 : i32, i32
  }
  func.func @transform_1(%arg0: i32, %arg1: memref<1xi32, #tpu.memory_space<smem>>) -> (i32, i32) {
    %c0_i32 = arith.constant 0 : i32
    %c0_i32_0 = arith.constant 0 : i32
    %c0_i32_1 = arith.constant 0 : i32
    return %c0_i32, %c0_i32_0 : i32, i32
  }
  func.func @transform_2(%arg0: i32, %arg1: memref<1xi32, #tpu.memory_space<smem>>) -> (i32, i32) {
    %c0_i32 = arith.constant 0 : i32
    %c0_i32_0 = arith.constant 0 : i32
    %c0_i32_1 = arith.constant 0 : i32
    return %c0_i32, %c0_i32_0 : i32, i32
  }
  func.func @transform_3(%arg0: i32, %arg1: memref<1xi32, #tpu.memory_space<smem>>) -> (i32, i32) {
    %c0_i32 = arith.constant 0 : i32
    %c0_i32_0 = arith.constant 0 : i32
    %c0_i32_1 = arith.constant 0 : i32
    return %c0_i32, %c0_i32_0 : i32, i32
  }
  func.func @transform_4(%arg0: i32, %arg1: memref<1xi32, #tpu.memory_space<smem>>) -> (i32, i32) {
    %c0_i32 = arith.constant 0 : i32
    %c0_i32_0 = arith.constant 0 : i32
    %c0_i32_1 = arith.constant 0 : i32
    return %c0_i32, %c0_i32_0 : i32, i32
  }
  func.func @transform_5(%arg0: i32, %arg1: memref<1xi32, #tpu.memory_space<smem>>) -> (i32, i32) {
    %c0_i32 = arith.constant 0 : i32
    %c0_i32_0 = arith.constant 0 : i32
    return %arg0, %c0_i32 : i32, i32
  }
}

</mosaic_0001>

<bundles_post_ra>
// kernel: fc_output_model.1
= control target key start
LH: loop header
LB: loop body
LE: loop exit
PB: predicated region body
PF: predicated region fallthrough
CT: control target
= control target key end

     0   :  { %s1067_s23 = smov 0   ;;  %s1342_s0 = inlined_call_operand.<no memory space> [shape: s32[1], index: 0, kind: input, shape index: {}]   ;;  %s1343_s1 = inlined_call_operand.vmem [shape: bf16[24,256], index: 1, kind: input, shape index: {}]   ;;  %s1344_s2 = inlined_call_operand.vmem [shape: bf16[256,256], index: 2, kind: input, shape index: {}]   ;;  %s1345_s3 = inlined_call_operand.vmem [shape: f32[1,256], index: 3, kind: input, shape index: {}]   ;;  %s1346_s4 = inlined_call_operand.vmem [shape: bf16[256,128], index: 4, kind: input, shape index: {}]   ;;  %s1347_s5 = inlined_call_operand.vmem [shape: f32[1,128], index: 5, kind: input, shape index: {}]   ;;  %s1348_s6 = inlined_call_operand.vmem [shape: f32[24,128], index: 6, kind: output, shape index: {}]  }
   0x1   :  { %11 = sst [smem:[#allocation3]] %s1342_s0 }
   0x2 LB: > { %s1073_s24 = sadd.s32 4294967295, %s1027_s23   ;;  %p754_p0 = scmp.ge.s32.totalorder %s1027_s23, 1  ;;  %s1027_s23 = sphi %s1067_s23, %s17_s23  }
   0x3   : > { %p189_p1 = scmp.lt.s32.totalorder %s1027_s23, 4 }
   0x5   : > { %p190_p2 = pnand %p754_p0, %p189_p1 }
   0x6   : > { %p216_p3 = scmp.lt.s32.totalorder (!%p190_p2), %s1073_s24, 2  ;;  %s494_s18 = sld [smem:[#allocation3]] (!%p190_p2) }
   0x7   : > { %193 = sbr.rel (%p190_p2) target bundleno = 571 (0x23b), region = 40 }
   0xc   : > { %v816_v0 = vld [vmem:[%s1344_s2 + $0x70] sm:$0xf]  ;;  %v975_v1 = vld [vmem:[%s1344_s2 + $0x74] sm:$0xf0]  ;;  %v974_v5 = vld [vmem:[%s1344_s2 + $0x74] sm:$0xf] }
   0xd   : > { %v880_v2 = vld [vmem:[%s1344_s2 + $0xf0] sm:$0xf]  ;;  %v817_v3 = vor.u32 %v975_v1, %v816_v0  ;;  %v991_v4 = vld [vmem:[%s1344_s2 + $0xf4] sm:$0xf0]  ;;  %v818_v6 = vld [vmem:[%s1344_s2 + $0x78] sm:$0xf0] }
   0xe   : > { %v881_v7 = vor.u32 %v991_v4, %v880_v2  ;;  %v821_v8 = vor.u32 %v974_v5, %v818_v6  ;;  %v990_v9 = vld [vmem:[%s1344_s2 + $0xf4] sm:$0xf]  ;;  %v882_v10 = vld [vmem:[%s1344_s2 + $0xf8] sm:$0xf0]  ;;  %v808_v11 = vld [vmem:[%s1344_s2 + $0x60] sm:$0xf] }
   0xf   : > { %431 = vmatpush.bf16.msra.mxu0 %v817_v3  ;;  %v885_v12 = vor.u32 %v990_v9, %v882_v10  ;;  %v973_v13 = vld [vmem:[%s1344_s2 + $0x64] sm:$0xf0]  ;;  %v872_v14 = vld [vmem:[%s1344_s2 + $0xe0] sm:$0xf]  ;;  %v972_v18 = vld [vmem:[%s1344_s2 + $0x64] sm:$0xf] }
  0x10   : > { %v989_v15 = vld [vmem:[%s1344_s2 + $0xe4] sm:$0xf0]  ;;  %444 = vmatpush.bf16.msra.mxu1 %v881_v7  ;;  %457 = vmatpush.bf16.msra.mxu2 %v821_v8  ;;  %v809_v16 = vor.u32 %v973_v13, %v808_v11  ;;  %v810_v19 = vld [vmem:[%s1344_s2 + $0x68] sm:$0xf0]  ;;  %v988_v20 = vld [vmem:[%s1344_s2 + $0xe4] sm:$0xf] }
  0x11   : > { %v873_v17 = vor.u32 %v989_v15, %v872_v14  ;;  %470 = vmatpush.bf16.msra.mxu3 %v885_v12  ;;  %v813_v21 = vor.u32 %v972_v18, %v810_v19  ;;  %v874_v22 = vld [vmem:[%s1344_s2 + $0xe8] sm:$0xf0]  ;;  %v800_v23 = vld [vmem:[%s1344_s2 + $0x50] sm:$0xf]  ;;  %v971_v24 = vld [vmem:[%s1344_s2 + $0x54] sm:$0xf0] }
  0x12   : > { %v877_v25 = vor.u32 %v988_v20, %v874_v22  ;;  %v864_v26 = vld [vmem:[%s1344_s2 + $0xd0] sm:$0xf]  ;;  %v987_v27 = vld [vmem:[%s1344_s2 + $0xd4] sm:$0xf0]  ;;  %v970_v28 = vld [vmem:[%s1344_s2 + $0x54] sm:$0xf]  ;;  %v801_v29 = vor.u32 %v971_v24, %v800_v23 }
  0x13   : > { %432 = vmatpush.bf16.msra.mxu0 %v809_v16  ;;  %v802_v30 = vld [vmem:[%s1344_s2 + $0x58] sm:$0xf0]  ;;  %v986_v31 = vld [vmem:[%s1344_s2 + $0xd4] sm:$0xf]  ;;  %v865_v33 = vor.u32 %v987_v27, %v864_v26  ;;  %v792_v35 = vld [vmem:[%s1344_s2 + $0x40] sm:$0xf] }
  0x14   : > { %v866_v32 = vld [vmem:[%s1344_s2 + $0xd8] sm:$0xf0]  ;;  %445 = vmatpush.bf16.msra.mxu1 %v873_v17  ;;  %458 = vmatpush.bf16.msra.mxu2 %v813_v21  ;;  %v805_v34 = vor.u32 %v970_v28, %v802_v30  ;;  %v969_v36 = vld [vmem:[%s1344_s2 + $0x44] sm:$0xf0]  ;;  %v856_v37 = vld [vmem:[%s1344_s2 + $0xc0] sm:$0xf] }
  0x15   : > { %471 = vmatpush.bf16.msra.mxu3 %v877_v25  ;;  %v869_v38 = vor.u32 %v986_v31, %v866_v32  ;;  %v985_v39 = vld [vmem:[%s1344_s2 + $0xc4] sm:$0xf0]  ;;  %v968_v40 = vld [vmem:[%s1344_s2 + $0x44] sm:$0xf]  ;;  %v794_v41 = vld [vmem:[%s1344_s2 + $0x48] sm:$0xf0]  ;;  %v793_v44 = vor.u32 %v969_v36, %v792_v35 }
  0x16   : > { %v984_v42 = vld [vmem:[%s1344_s2 + $0xc4] sm:$0xf]  ;;  %v858_v43 = vld [vmem:[%s1344_s2 + $0xc8] sm:$0xf0]  ;;  %v857_v45 = vor.u32 %v985_v39, %v856_v37  ;;  %v797_v46 = vor.u32 %v968_v40, %v794_v41  ;;  %v784_v47 = vld [vmem:[%s1344_s2 + $0x30] sm:$0xf] }
  0x17   : > { %433 = vmatpush.bf16.msra.mxu0 %v801_v29  ;;  %v967_v48 = vld [vmem:[%s1344_s2 + $0x34] sm:$0xf0]  ;;  %v848_v49 = vld [vmem:[%s1344_s2 + $0xb0] sm:$0xf]  ;;  %v861_v50 = vor.u32 %v984_v42, %v858_v43  ;;  %v966_v52 = vld [vmem:[%s1344_s2 + $0x34] sm:$0xf] }
  0x18   : > { %446 = vmatpush.bf16.msra.mxu1 %v865_v33  ;;  %459 = vmatpush.bf16.msra.mxu2 %v805_v34  ;;  %v983_v51 = vld [vmem:[%s1344_s2 + $0xb4] sm:$0xf0]  ;;  %v786_v53 = vld [vmem:[%s1344_s2 + $0x38] sm:$0xf0]  ;;  %v982_v54 = vld [vmem:[%s1344_s2 + $0xb4] sm:$0xf]  ;;  %v785_v56 = vor.u32 %v967_v48, %v784_v47  ;;  %v484_v47 = vlaneseq }
  0x19   : > { %472 = vmatpush.bf16.msra.mxu3 %v869_v38  ;;  %v850_v55 = vld [vmem:[%s1344_s2 + $0xb8] sm:$0xf0]  ;;  %v849_v57 = vor.u32 %v983_v51, %v848_v49  ;;  %v789_v58 = vor.u32 %v966_v52, %v786_v53  ;;  %v776_v59 = vld [vmem:[%s1344_s2 + $0x20] sm:$0xf]  ;;  %v965_v60 = vld [vmem:[%s1344_s2 + $0x24] sm:$0xf0] }
  0x1a   : > { %v840_v61 = vld [vmem:[%s1344_s2 + $0xa0] sm:$0xf]  ;;  %v853_v62 = vor.u32 %v982_v54, %v850_v55  ;;  %v981_v63 = vld [vmem:[%s1344_s2 + $0xa4] sm:$0xf0]  ;;  %v964_v0 = vld [vmem:[%s1344_s2 + $0x24] sm:$0xf]  ;;  %v777_v4 = vor.u32 %v965_v60, %v776_v59  ;;  %v495_v54 = vstv %s494_s18 }
  0x1b   : > { %434 = vmatpush.bf16.msra.mxu0 %v793_v44  ;;  %v778_v1 = vld [vmem:[%s1344_s2 + $0x28] sm:$0xf0]  ;;  %v980_v2 = vld [vmem:[%s1344_s2 + $0xa4] sm:$0xf]  ;;  %v768_v5 = vld [vmem:[%s1344_s2 + $0x10] sm:$0xf]  ;;  %v841_v6 = vor.u32 %v981_v63, %v840_v61 }
  0x1c   : > { %447 = vmatpush.bf16.msra.mxu1 %v857_v45  ;;  %460 = vmatpush.bf16.msra.mxu2 %v797_v46  ;;  %v842_v3 = vld [vmem:[%s1344_s2 + $0xa8] sm:$0xf0]  ;;  %v781_v7 = vor.u32 %v964_v0, %v778_v1  ;;  %v963_v8 = vld [vmem:[%s1344_s2 + $0x14] sm:$0xf0]  ;;  %v832_v9 = vld [vmem:[%s1344_s2 + $0x90] sm:$0xf] }
  0x1d   : > { %473 = vmatpush.bf16.msra.mxu3 %v861_v50  ;;  %v979_v10 = vld [vmem:[%s1344_s2 + $0x94] sm:$0xf0]  ;;  %v845_v11 = vor.u32 %v980_v2, %v842_v3  ;;  %v962_v12 = vld [vmem:[%s1344_s2 + $0x14] sm:$0xf]  ;;  %v770_v13 = vld [vmem:[%s1344_s2 + $0x18] sm:$0xf0]  ;;  %v769_v16 = vor.u32 %v963_v8, %v768_v5 }
  0x1e   : > { %v978_v14 = vld [vmem:[%s1344_s2 + $0x94] sm:$0xf]  ;;  %v834_v15 = vld [vmem:[%s1344_s2 + $0x98] sm:$0xf0]  ;;  %v760_v17 = vld [vmem:[%s1344_s2] sm:$0xf]  ;;  %v833_v19 = vor.u32 %v979_v10, %v832_v9  ;;  %v773_v20 = vor.u32 %v962_v12, %v770_v13 }
  0x1f   : > { %435 = vmatpush.bf16.msra.mxu0 %v785_v56  ;;  %v961_v18 = vld [vmem:[%s1344_s2 + $0x4] sm:$0xf0]  ;;  %s1253_s26 = scalar_select %p216_p3, %s1073_s24, 2  ;;  %v824_v21 = vld [vmem:[%s1344_s2 + $0x80] sm:$0xf]  ;;  %v837_v24 = vor.u32 %v978_v14, %v834_v15  ;;  %v999_v35 = vld [vmem:[%s1346_s4 + $0x38] sm:$0xff] }
  0x20   : > { %448 = vmatpush.bf16.msra.mxu1 %v849_v57  ;;  %461 = vmatpush.bf16.msra.mxu2 %v789_v58  ;;  %v977_v22 = vld [vmem:[%s1344_s2 + $0x84] sm:$0xf0]  ;;  %v960_v23 = vld [vmem:[%s1344_s2 + $0x4] sm:$0xf]  ;;  %v762_v25 = vld [vmem:[%s1344_s2 + $0x8] sm:$0xf0]  ;;  %v761_v28 = vor.u32 %v961_v18, %v760_v17 }
  0x21   : > { %474 = vmatpush.bf16.msra.mxu3 %v853_v62  ;;  %s959_s10 = sshll.u32 %s1253_s26, 3  ;;  %v976_v26 = vld [vmem:[%s1344_s2 + $0x84] sm:$0xf]  ;;  %v826_v27 = vld [vmem:[%s1344_s2 + $0x88] sm:$0xf0]  ;;  %v825_v30 = vor.u32 %v977_v22, %v824_v21  ;;  %v765_v31 = vor.u32 %v960_v23, %v762_v25  ;;  %v1007_v37 = vld [vmem:[%s1346_s4 + $0x78] sm:$0xff] }
  0x22   : > { %s220_s17 = scalar_lea.vmem %s1343_s1, %s959_s10  ;;  %v829_v34 = vor.u32 %v976_v26, %v826_v27  ;;  %v998_v39 = vld [vmem:[%s1346_s4 + $0x30] sm:$0xff]  ;;  %v997_v41 = vld [vmem:[%s1346_s4 + $0x28] sm:$0xff]  ;;  %v996_v43 = vld [vmem:[%s1346_s4 + $0x20] sm:$0xff]  ;;  %v485_v48 = vshrl.u32 %v484_v47, 7  ;;  %v489_v51 = vand.u32 127, %v484_v47  ;;  %s224_s15 = scalar_lea.vmem %s1348_s6, %s959_s10 }
  0x23   : > { %436 = vmatpush.bf16.msra.mxu0 %v777_v4  ;;  %v225_v29 = vld [vmem:[%s220_s17] sm:$0xff]  ;;  %v1006_v40 = vld [vmem:[%s1346_s4 + $0x70] sm:$0xff]  ;;  %v1005_v42 = vld [vmem:[%s1346_s4 + $0x68] sm:$0xff]  ;;  %s886_s17 = sshll.u32 %s1073_s24, 3 }
  0x24   : > { %449 = vmatpush.bf16.msra.mxu1 %v841_v6  ;;  %462 = vmatpush.bf16.msra.mxu2 %v781_v7  ;;  %v265_v32 = vunpack.c.l.b16 %v225_v29  ;;  %v266_v33 = vunpack.c.h.b16 %v225_v29  ;;  %v1004_v44 = vld [vmem:[%s1346_s4 + $0x60] sm:$0xff]  ;;  %v995_v45 = vld [vmem:[%s1346_s4 + $0x18] sm:$0xff]  ;;  %v994_v46 = vld [vmem:[%s1346_s4 + $0x10] sm:$0xff]  ;;  %v486_v49 = vstv %s886_s17  ;;  %v490_v55 = vadd.s32 128, %v489_v51 }
  0x25   : > { %475 = vmatpush.bf16.msra.mxu3 %v845_v11  ;;  %v487_v50 = vadd.s32 %v486_v49, %v485_v48  ;;  %v1003_v59 = vld [vmem:[%s1346_s4 + $0x58] sm:$0xff]  ;;  %v993_v60 = vld [vmem:[%s1346_s4 + $0x8] sm:$0xff]  ;;  %v1002_v63 = vld [vmem:[%s1346_s4 + $0x50] sm:$0xff] }
  0x26   : > { %v267_v36 = vpack.c.b16 %v265_v32, %v265_v32  ;;  %v268_v38 = vpack.c.b16 %v266_v33, %v266_v33  ;;  %v992_v1 = vld [vmem:[%s1346_s4] sm:$0xff]  ;;  %v1001_v3 = vld [vmem:[%s1346_s4 + $0x48] sm:$0xff] }
  0x27   : > { %437 = vmatpush.bf16.msra.mxu0 %v769_v16  ;;  %v491_v52 = vmul.u32 256, %v487_v50  ;;  %v1000_v6 = vld [vmem:[%s1346_s4 + $0x40] sm:$0xff] }
  0x28   : > { %450 = vmatpush.bf16.msra.mxu1 %v833_v19  ;;  %463 = vmatpush.bf16.msra.mxu2 %v773_v20  ;;  %v258_v13 = vld [vmem:[%s1345_s3] sm:$0x3] }
  0x29   : > { %476 = vmatpush.bf16.msra.mxu3 %v837_v24  ;;  %v492_v53 = vadd.s32 %v491_v52, %v489_v51  ;;  %v493_v57 = vadd.s32 %v491_v52, %v490_v55  ;;  %v260_v16 = vperm.slane %v258_v13, 0  ;;  %v261_v24 = vperm.slane %v258_v13, 1 }
  0x2b   : > { %438 = vmatpush.bf16.msra.mxu0 %v761_v28  ;;  %v496_v56 = vxor.u32 %v495_v54, %v492_v53  ;;  %v497_v61 = vxor.u32 %v495_v54, %v493_v57 }
  0x2c   : > { %451 = vmatpush.bf16.msra.mxu1 %v825_v30  ;;  %464 = vmatpush.bf16.msra.mxu2 %v765_v31 }
  0x2d   : > { %477 = vmatpush.bf16.msra.mxu3 %v829_v34  ;;  %v498_v58 = vshrl.u32 %v496_v56, 16  ;;  %v499_v0 = vshrl.u32 %v497_v61, 16 }
  0x2e   : > { %439 = vmatmul.bf16.vlgmr.msra.gmra.mxu0 %v267_v36 }
  0x2f   : > { %660 = vmatpush.bf16.msrb.mxu0 %v999_v35  ;;  %452 = vmatmul.bf16.vlgmr.msra.gmra.mxu1 %v268_v38  ;;  %v500_v62 = vxor.u32 %v498_v58, %v496_v56  ;;  %v501_v4 = vxor.u32 %v499_v0, %v497_v61 }
  0x30   : > { %673 = vmatpush.bf16.msrb.mxu1 %v1007_v37  ;;  %465 = vmatmul.bf16.vlgmr.msra.gmra.mxu2 %v267_v36 }
  0x31   : > { %478 = vmatmul.bf16.vlgmr.msra.gmra.mxu3 %v268_v38  ;;  %v502_v2 = vmul.u32 2246822507, %v500_v62  ;;  %v503_v7 = vmul.u32 2246822507, %v501_v4  ;;  %v1016_v38 = vld [vmem:[%s1347_s5] ss:$0 sm:$0xff] }
  0x33   : > { %661 = vmatpush.bf16.msrb.mxu0 %v998_v39  ;;  %v504_v5 = vshrl.u32 %v502_v2, 13  ;;  %v505_v9 = vshrl.u32 %v503_v7, 13 }
  0x34   : > { %674 = vmatpush.bf16.msrb.mxu1 %v1006_v40 }
  0x35   : > { %v506_v8 = vxor.u32 %v504_v5, %v502_v2  ;;  %v507_v11 = vxor.u32 %v505_v9, %v503_v7 }
  0x37   : > { %662 = vmatpush.bf16.msrb.mxu0 %v997_v41  ;;  %v508_v10 = vmul.u32 3266489909, %v506_v8  ;;  %v509_v14 = vmul.u32 3266489909, %v507_v11 }
  0x38   : > { %675 = vmatpush.bf16.msrb.mxu1 %v1005_v42 }
  0x39   : > { %v510_v12 = vshrl.u32 %v508_v10, 16  ;;  %v511_v17 = vshrl.u32 %v509_v14, 16 }
  0x3b   : > { %663 = vmatpush.bf16.msrb.mxu0 %v996_v43  ;;  %v512_v15 = vxor.u32 %v510_v12, %v508_v10  ;;  %v513_v22 = vxor.u32 %v511_v17, %v509_v14 }
  0x3c   : > { %676 = vmatpush.bf16.msrb.mxu1 %v1004_v44 }
  0x3d   : > { %v514_v18 = vand.u32 1, %v512_v15  ;;  %v515_v26 = vand.u32 1, %v513_v22 }
  0x3f   : > { %664 = vmatpush.bf16.msrb.mxu0 %v995_v45  ;;  %vm516_vm0 = vcmp.eq.s32.totalorder %v514_v18, 0  ;;  %vm517_vm4 = vcmp.eq.s32.totalorder %v515_v26, 0 }
  0x40   : > { %677 = vmatpush.bf16.msrb.mxu1 %v1003_v59 }
  0x43   : > { %665 = vmatpush.bf16.msrb.mxu0 %v994_v46 }
  0x44   : > { %678 = vmatpush.bf16.msrb.mxu1 %v1002_v63 }
  0x47   : > { %666 = vmatpush.bf16.msrb.mxu0 %v993_v60 }
  0x48   : > { %679 = vmatpush.bf16.msrb.mxu1 %v1001_v3 }
  0x4b   : > { %667 = vmatpush.bf16.msrb.mxu0 %v992_v1 }
  0x4c   : > { %680 = vmatpush.bf16.msrb.mxu1 %v1000_v6 }
  0xab   : > { %v440_v19 = vpop.f32.mrf.mxu0 }
  0xac   : > { %v441_v20 = vadd.f32 %v440_v19, %v260_v16  ;;  %v453_v21 = vpop.f32.mrf.mxu1 }
  0xae   : > { %v454_v23 = vadd.f32 %v453_v21, %v441_v20 }
  0xb0   : > { %vm518_vm1 = vcmp.gt.f32.partialorder %v454_v23, 0.0  ;;  %v522_v25 = vmul.f32 2.0, %v454_v23 }
  0xb1   : > { %vm520_vm2 = vmand %vm516_vm0, %vm518_vm1 }
  0xb2   : > { %v952_v27 = vpack.c.bf16 %v522_v25, %v522_v25  ;;  %vm951_vm3 = vmpackc.low %vm520_vm2, %vm520_vm2 }
  0xb3   : > { %v466_v28 = vpop.f32.mrf.mxu2  ;;  %v442_v31 = vpop.f32.mrf.mxu0 }
  0xb4   : > { %v467_v29 = vadd.f32 %v466_v28, %v261_v24  ;;  %v479_v30 = vpop.f32.mrf.mxu3  ;;  %v455_v32 = vpop.f32.mrf.mxu1  ;;  %953 = vmatmul.msk.bf16.vlgmr.msrb.gmra.mxu0 %vm951_vm3, %v952_v27 }
  0xb6   : > { %v480_v33 = vadd.f32 %v479_v30, %v467_v29 }
  0xb8   : > { %vm519_vm5 = vcmp.gt.f32.partialorder %v480_v33, 0.0  ;;  %v523_v34 = vmul.f32 2.0, %v480_v33 }
  0xb9   : > { %vm521_vm6 = vmand %vm517_vm4, %vm519_vm5 }
  0xba   : > { %v955_v35 = vpack.c.bf16 %v523_v34, %v523_v34  ;;  %vm954_vm7 = vmpackc.low %vm521_vm6, %vm521_vm6 }
  0xbb   : > { %v468_v36 = vpop.f32.mrf.mxu2 }
  0xbc   : > { %v481_v37 = vpop.f32.mrf.mxu3  ;;  %956 = vmatmul.msk.bf16.vlgmr.msrb.gmra.mxu1 %vm954_vm7, %v955_v35 }
 0x131   : > { %v669_v39 = vpop.f32.mrf.mxu0 }
 0x132   : > { %v670_v40 = vadd.f32 %v1016_v38, %v669_v39 }
 0x139   : > { %v682_v41 = vpop.f32.mrf.mxu1  ;;  %v671_v43 = vpop.f32.mrf.mxu0 }
 0x13a   : > { %v683_v42 = vadd.f32 %v682_v41, %v670_v40 }
 0x13c   : > { %686 = vmax.xlane.f32.xlu0 %v683_v42 }
 0x141   : > { %v684_v44 = vpop.f32.mrf.mxu1 }
 0x1af   : > { %v687_v45 = vpop.xlane.xlu0 %686 }
 0x1b0   : > { %v688_v46 = vsub.f32 %v683_v42, %v687_v45 }
 0x1b2   : > { %v689_v47 = vmul.f32 1.442695, %v688_v46 }
 0x1b4   : > { %1017 = vpow2.f32 %v689_v47 }
 0x1ba   : > { %v1018_v48 = vpop.eup %1017 }
 0x1bb   : > { %691 = vadd.xlane.f32.xlu0 %v1018_v48 }
 0x22e   : > { %v692_v49 = vpop.xlane.xlu0 %691 }
 0x22f   : > { %1019 = vlog2.f32 %v692_v49 }
 0x235   : > { %v1020_v50 = vpop.eup %1019 }
 0x236   : > { %v694_v51 = vmul.f32 0.6931472, %v1020_v50 }
 0x238   : > { %v695_v52 = vsub.f32 %v688_v46, %v694_v51 }
 0x23a   : > { %696 = vst [vmem:[%s224_s15] sm:$0xff] %v695_v52 }
 0x23b PF: > { %s17_s23 = sadd.s32 1, %s1027_s23  }
 0x23c   : > { %p14_p4 = scmp.ge.s32.totalorder %s17_s23, 5  }
 0x23e   :  { %16 = sbr.rel (!%p14_p4) target bundleno = 2 (0x2), region = 70 }

</bundles_post_ra>
